<compile_context>
chip_gen: v7x
topology: tpu7x:2x2x1
jax: 0.10.0
libtpu: 0.0.40
codegen_flags: <defaults>
</compile_context>

<pallas_src>
import jax
import jax.numpy as jnp
from jax import lax
from jax.experimental import pallas as pl
from jax.experimental.pallas import tpu as pltpu


def _cdiv(a, b):
    return -(-a // b)


def _sigmoid(x):
    # EUP-only sigmoid: one tanh, no divide (review: avoid exp + full VPU divide).
    return 0.5 * jnp.tanh(0.5 * x) + 0.5


def hsc19_rgb_kernel(e1_ref, e2_ref, scT_ref,
                     w1aT_ref, w1bT_ref, w1cT_ref, b1T_ref,
                     w2T_ref, b2T_ref, whT_ref, bhT_ref,
                     out_ref):
    f32 = jnp.float32
    nt = (((1,), (1,)), ((), ()))          # contract last dim of both operands

    scT = scT_ref[...]                     # (color_dim, tb), lane-dense

    # color_fc1: sigmoid(W1 @ [emb1, emb2, sc]^T + b1), as the sum of three
    # partial matmuls so the wrapper never materializes the concat.
    z1 = (lax.dot_general(w1aT_ref[...], e1_ref[...], nt,
                          preferred_element_type=f32)
          + lax.dot_general(w1bT_ref[...], e2_ref[...], nt,
                            preferred_element_type=f32)
          + jnp.dot(w1cT_ref[...], scT, preferred_element_type=f32)
          + b1T_ref[...])
    x1T = _sigmoid(z1)                     # (hidden_1, tb)

    # color_fc2
    x2T = _sigmoid(
        jnp.dot(w2T_ref[...], x1T, preferred_element_type=f32) + b2T_ref[...])  # (hidden_2, tb)

    # fused heads: rows [k*g : k*g + od] are m1, m2, m3, beta for k = 0..3
    headT = _sigmoid(
        jnp.dot(whT_ref[...], x2T, preferred_element_type=f32) + bhT_ref[...])  # (4*g, tb)

    od = scT_ref.shape[0]                  # output_dim (== color_dim == 3)
    g = whT_ref.shape[0] // 4              # 8-sublane-aligned head stride

    # torch.bmm(m, sc) + beta, one output row at a time: VPU multiply + 3-row
    # sublane sum, stored directly into the output block (no sublane concat).
    for k in range(od):
        mr_k = jnp.sum(headT[k * g:k * g + od, :] * scT, axis=0, keepdims=True)  # (1, tb)
        out_ref[k:k + 1, :] = mr_k + headT[3 * g + k:3 * g + k + 1, :]


def hsc19_rgb_forward(emb1, emb2, source_color, params, *, block_batch=8192):
    B, input_dim = emb1.shape
    color_dim = source_color.shape[1]
    hidden_1 = params["w1"].shape[1]
    hidden_2 = params["w2"].shape[1]
    output_dim = params["wm1"].shape[1]
    if output_dim != color_dim or output_dim != 3:
        raise ValueError("HSC19_RGB requires output_dim == color_dim == 3 "
                         "(torch.bmm contraction and `mr + beta`).")

    # --- one-time (tiny) parameter re-layout for the batch-on-lanes kernel ---
    w1T = params["w1"].T                                    # (hidden_1, d_in)
    w1aT = w1T[:, :input_dim]                               # emb1 rows
    w1bT = w1T[:, input_dim:2 * input_dim]                  # emb2 rows
    w1cT = w1T[:, 2 * input_dim:]                           # source_color rows
    b1T = params["b1"].reshape(hidden_1, 1)
    w2T = params["w2"].T                                    # (hidden_2, hidden_1)
    b2T = params["b2"].reshape(hidden_2, 1)

    g = 8 * _cdiv(output_dim, 8)                            # sublane-aligned head stride
    pad_head = lambda a: jnp.pad(a, ((0, 0), (0, g - output_dim)))
    whT = jnp.concatenate(
        [pad_head(params["wm1"]), pad_head(params["wm2"]),
         pad_head(params["wm3"]), pad_head(params["wb"])], axis=1).T  # (4*g, hidden_2)
    bhT = jnp.concatenate(
        [pad_head(params["bm1"]), pad_head(params["bm2"]),
         pad_head(params["bm3"]), pad_head(params["bb"])], axis=1).reshape(4 * g, 1)

    # --- batch tile selection -------------------------------------------------
    # VMEM budget: the (tb, input_dim) emb windows lane-pad to a multiple of 128
    # inside the (8,128) tiling; 2 inputs x 2 pipeline buffers must fit ~24 MiB
    # (leaves headroom under the 32 MiB limit and v7x's 64 MiB physical VMEM).
    lane_in = 128 * _cdiv(input_dim, 128)
    vmem_cap = max(128, ((24 * 1024 * 1024) // (2 * 2 * lane_in * 4) // 128) * 128)
    cap = max(128, min((int(block_batch) // 128) * 128 or 128, 8192, vmem_cap))
    # Choose tb so the number of grid steps is minimal for this cap and the
    # padding of B up to a tile multiple stays small (< 128 rows per step).
    n_steps = _cdiv(B, cap)
    tb = min(cap, 128 * _cdiv(_cdiv(B, n_steps), 128))
    Bp = n_steps * tb

    # source_color is transposed once in the wrapper (tiny (B,3) array): the
    # kernel wants it lane-dense (3, tb) so the fc1 term is a plain dot and the
    # bmm contraction is a dense VPU multiply; feeding it as (tb,3) blocks would
    # mean 12-byte-row DMAs and lane-sparse vregs inside the kernel.
    scT = source_color.T                                    # (color_dim, B)

    if Bp != B:
        # Pad the batch up to a tile multiple (review: never fall back to one
        # full-batch block).  Padded rows are zeros and are sliced off below.
        pad_rows = Bp - B
        emb1 = jnp.pad(emb1, ((0, pad_rows), (0, 0)))
        emb2 = jnp.pad(emb2, ((0, pad_rows), (0, 0)))
        scT = jnp.pad(scT, ((0, 0), (0, pad_rows)))

    grid = (Bp // tb,)
    const = lambda i: (0, 0)                                # weights stay VMEM-resident
    out_T = pl.pallas_call(
        hsc19_rgb_kernel,
        out_shape=jax.ShapeDtypeStruct((output_dim, Bp), jnp.float32),
        grid_spec=pltpu.PrefetchScalarGridSpec(
            num_scalar_prefetch=0,
            grid=grid,
            in_specs=[
                pl.BlockSpec((tb, input_dim), lambda i: (i, 0)),    # emb1
                pl.BlockSpec((tb, input_dim), lambda i: (i, 0)),    # emb2
                pl.BlockSpec((color_dim, tb), lambda i: (0, i)),    # source_color^T
                pl.BlockSpec((hidden_1, input_dim), const),         # w1aT
                pl.BlockSpec((hidden_1, input_dim), const),         # w1bT
                pl.BlockSpec((hidden_1, color_dim), const),         # w1cT
                pl.BlockSpec((hidden_1, 1), const),                 # b1T
                pl.BlockSpec((hidden_2, hidden_1), const),          # w2T
                pl.BlockSpec((hidden_2, 1), const),                 # b2T
                pl.BlockSpec((4 * g, hidden_2), const),             # fused head W^T
                pl.BlockSpec((4 * g, 1), const),                    # fused head b^T
            ],
            out_specs=pl.BlockSpec((output_dim, tb), lambda i: (0, i)),
        ),
        compiler_params=pltpu.CompilerParams(
            dimension_semantics=("parallel",),    # shard batch grid across TCs (v7x)
            vmem_limit_bytes=32 * 1024 * 1024,
        ),
    )(emb1, emb2, scT, w1aT, w1bT, w1cT, b1T, w2T, b2T, whT, bhT)

    # The module contract is a (B, 3) result, so one layout conversion is
    # unavoidable; doing it here (dense (3,B) -> (B,3) XLA transpose, fused by
    # jit) is cheaper than lane-sparse (tb,3) stores inside the kernel.
    out = out_T.T                                           # (Bp, output_dim)
    return out[:B] if Bp != B else out


def init_params(key, input_dim, color_dim, output_dim, hidden_1, hidden_2):
    """Deterministic synthetic parameters; weights stored (in, out)
    (i.e. transposed relative to torch.nn.Linear's (out, in))."""
    d_in = 2 * input_dim + color_dim
    layer_dims = {
        "1": (d_in, hidden_1),
        "2": (hidden_1, hidden_2),
        "m1": (hidden_2, output_dim),
        "m2": (hidden_2, output_dim),
        "m3": (hidden_2, output_dim),
        "b": (hidden_2, output_dim),
    }
    params = {}
    for name in sorted(layer_dims):
        fan_in, fan_out = layer_dims[name]
        key, kw, kb = jax.random.split(key, 3)
        bound = 1.0 / (fan_in ** 0.5)
        params["w" + name] = jax.random.uniform(
            kw, (fan_in, fan_out), jnp.float32, minval=-bound, maxval=bound)
        params["b" + name] = jax.random.uniform(
            kb, (1, fan_out), jnp.float32, minval=-bound, maxval=bound)
    return params


def reference_forward(emb1, emb2, source_color, p):
    x = jnp.concatenate([emb1, emb2, source_color], axis=-1)
    x1 = jax.nn.sigmoid(x @ p["w1"] + p["b1"])
    x2 = jax.nn.sigmoid(x1 @ p["w2"] + p["b2"])
    m1 = jax.nn.sigmoid(x2 @ p["wm1"] + p["bm1"])
    m2 = jax.nn.sigmoid(x2 @ p["wm2"] + p["bm2"])
    m3 = jax.nn.sigmoid(x2 @ p["wm3"] + p["bm3"])
    beta = jax.nn.sigmoid(x2 @ p["wb"] + p["bb"])
    m = jnp.stack([m1, m2, m3], axis=1)                    # (B, 3, output_dim)
    mr = jnp.einsum("bij,bj->bi", m, source_color)         # == torch.bmm(...).squeeze(-1)
    return mr + beta


if __name__ == "__main__":
    # Small shapes consistent with the module (output_dim == color_dim == 3,
    # module-default hidden sizes 30/10); batch=1000 with block_batch=256
    # exercises the multi-step pipelined grid AND the non-divisible-batch
    # padding path.
    batch, input_dim, color_dim, output_dim = 1000, 24, 3, 3
    hidden_1, hidden_2 = 30, 10

    key = jax.random.PRNGKey(0)
    k_p, k1, k2, k3 = jax.random.split(key, 4)
    params = init_params(k_p, input_dim, color_dim, output_dim, hidden_1, hidden_2)

    emb1 = jax.random.normal(k1, (batch, input_dim), dtype=jnp.float32)
    emb2 = jax.random.normal(k2, (batch, input_dim), dtype=jnp.float32)
    source_color = jax.random.uniform(k3, (batch, color_dim), dtype=jnp.float32)

    fwd = jax.jit(lambda a, b, c: hsc19_rgb_forward(a, b, c, params, block_batch=256))
    pred = jax.block_until_ready(fwd(emb1, emb2, source_color))

    ref = reference_forward(emb1, emb2, source_color, params)
    assert pred.shape == (batch, output_dim)
    max_err = float(jnp.max(jnp.abs(pred - ref)))
    assert jnp.allclose(pred, ref, atol=5e-4, rtol=5e-4), max_err
    print("KERNEL_OK")
</pallas_src>

<mosaic_0001>
module attributes {stable_mosaic.version = 11 : i64} {
  func.func @hsc19_rgb_kernel(%arg0: i32, %arg1: memref<256x24xf32, #tpu.memory_space<vmem>>, %arg2: memref<256x24xf32, #tpu.memory_space<vmem>>, %arg3: memref<3x256xf32, #tpu.memory_space<vmem>>, %arg4: memref<30x24xf32, #tpu.memory_space<vmem>>, %arg5: memref<30x24xf32, #tpu.memory_space<vmem>>, %arg6: memref<30x3xf32, #tpu.memory_space<vmem>>, %arg7: memref<30x1xf32, #tpu.memory_space<vmem>>, %arg8: memref<10x30xf32, #tpu.memory_space<vmem>>, %arg9: memref<10x1xf32, #tpu.memory_space<vmem>>, %arg10: memref<32x10xf32, #tpu.memory_space<vmem>>, %arg11: memref<32x1xf32, #tpu.memory_space<vmem>>, %arg12: memref<3x256xf32, #tpu.memory_space<vmem>>) attributes {dimension_semantics = [#tpu.dimension_semantics<parallel>], iteration_bounds = array<i64: 4>, scalar_prefetch = 0 : i64, scratch_operands = 0 : i64, tpu.core_type = #tpu.core_type<tc>, window_params = [{transform_indices = @transform_0, window_bounds = array<i64: 256, 24>}, {transform_indices = @transform_1, window_bounds = array<i64: 256, 24>}, {transform_indices = @transform_2, window_bounds = array<i64: 3, 256>}, {pipeline_mode = #tpu.pipeline_mode<synchronous>, transform_indices = @transform_3, window_bounds = array<i64: 30, 24>}, {pipeline_mode = #tpu.pipeline_mode<synchronous>, transform_indices = @transform_4, window_bounds = array<i64: 30, 24>}, {pipeline_mode = #tpu.pipeline_mode<synchronous>, transform_indices = @transform_5, window_bounds = array<i64: 30, 3>}, {pipeline_mode = #tpu.pipeline_mode<synchronous>, transform_indices = @transform_6, window_bounds = array<i64: 30, 1>}, {pipeline_mode = #tpu.pipeline_mode<synchronous>, transform_indices = @transform_7, window_bounds = array<i64: 10, 30>}, {pipeline_mode = #tpu.pipeline_mode<synchronous>, transform_indices = @transform_8, window_bounds = array<i64: 10, 1>}, {pipeline_mode = #tpu.pipeline_mode<synchronous>, transform_indices = @transform_9, window_bounds = array<i64: 32, 10>}, {pipeline_mode = #tpu.pipeline_mode<synchronous>, transform_indices = @transform_10, window_bounds = array<i64: 32, 1>}, {transform_indices = @transform_11, window_bounds = array<i64: 3, 256>}]} {
    %c0 = arith.constant 0 : index
    %c0_0 = arith.constant 0 : index
    %0 = vector.load %arg3[%c0, %c0_0] : memref<3x256xf32, #tpu.memory_space<vmem>>, vector<3x256xf32>
    %c0_1 = arith.constant 0 : index
    %c0_2 = arith.constant 0 : index
    %1 = vector.load %arg4[%c0_1, %c0_2] : memref<30x24xf32, #tpu.memory_space<vmem>>, vector<30x24xf32>
    %c0_3 = arith.constant 0 : index
    %c0_4 = arith.constant 0 : index
    %2 = vector.load %arg1[%c0_3, %c0_4] : memref<256x24xf32, #tpu.memory_space<vmem>>, vector<256x24xf32>
    %cst = arith.constant dense<0.000000e+00> : vector<30x256xf32>
    %3 = tpu.matmul %1, %2, %cst {dimension_numbers = #tpu.dot_dimension_numbers<[1], [1], [0], [0], [0, 0, 1, 0], [], []>} : vector<30x24xf32>, vector<256x24xf32>, vector<30x256xf32> -> vector<30x256xf32>
    %c0_5 = arith.constant 0 : index
    %c0_6 = arith.constant 0 : index
    %4 = vector.load %arg5[%c0_5, %c0_6] : memref<30x24xf32, #tpu.memory_space<vmem>>, vector<30x24xf32>
    %c0_7 = arith.constant 0 : index
    %c0_8 = arith.constant 0 : index
    %5 = vector.load %arg2[%c0_7, %c0_8] : memref<256x24xf32, #tpu.memory_space<vmem>>, vector<256x24xf32>
    %cst_9 = arith.constant dense<0.000000e+00> : vector<30x256xf32>
    %6 = tpu.matmul %4, %5, %cst_9 {dimension_numbers = #tpu.dot_dimension_numbers<[1], [1], [0], [0], [0, 0, 1, 0], [], []>} : vector<30x24xf32>, vector<256x24xf32>, vector<30x256xf32> -> vector<30x256xf32>
    %7 = arith.addf %3, %6 : vector<30x256xf32>
    %c0_10 = arith.constant 0 : index
    %c0_11 = arith.constant 0 : index
    %8 = vector.load %arg6[%c0_10, %c0_11] : memref<30x3xf32, #tpu.memory_space<vmem>>, vector<30x3xf32>
    %cst_12 = arith.constant dense<0.000000e+00> : vector<30x256xf32>
    %9 = tpu.matmul %8, %0, %cst_12 {dimension_numbers = #tpu.dot_dimension_numbers<[1], [0], [0], [1], [0, 0, 1, 1], [], []>} : vector<30x3xf32>, vector<3x256xf32>, vector<30x256xf32> -> vector<30x256xf32>
    %10 = arith.addf %7, %9 : vector<30x256xf32>
    %c0_13 = arith.constant 0 : index
    %c0_14 = arith.constant 0 : index
    %11 = vector.load %arg7[%c0_13, %c0_14] : memref<30x1xf32, #tpu.memory_space<vmem>>, vector<30x1xf32>
    %12 = vector.broadcast %11 : vector<30x1xf32> to vector<30x256xf32>
    %13 = arith.addf %10, %12 : vector<30x256xf32>
    %cst_15 = arith.constant 5.000000e-01 : f32
    %14 = vector.broadcast %cst_15 : f32 to vector<30x256xf32>
    %15 = arith.mulf %14, %13 : vector<30x256xf32>
    %16 = math.tanh %15 : vector<30x256xf32>
    %cst_16 = arith.constant 5.000000e-01 : f32
    %17 = vector.broadcast %cst_16 : f32 to vector<30x256xf32>
    %18 = arith.mulf %17, %16 : vector<30x256xf32>
    %cst_17 = arith.constant 5.000000e-01 : f32
    %19 = vector.broadcast %cst_17 : f32 to vector<30x256xf32>
    %20 = arith.addf %18, %19 : vector<30x256xf32>
    %c0_18 = arith.constant 0 : index
    %c0_19 = arith.constant 0 : index
    %21 = vector.load %arg8[%c0_18, %c0_19] : memref<10x30xf32, #tpu.memory_space<vmem>>, vector<10x30xf32>
    %cst_20 = arith.constant dense<0.000000e+00> : vector<10x256xf32>
    %22 = tpu.matmul %21, %20, %cst_20 {dimension_numbers = #tpu.dot_dimension_numbers<[1], [0], [0], [1], [0, 0, 1, 1], [], []>} : vector<10x30xf32>, vector<30x256xf32>, vector<10x256xf32> -> vector<10x256xf32>
    %c0_21 = arith.constant 0 : index
    %c0_22 = arith.constant 0 : index
    %23 = vector.load %arg9[%c0_21, %c0_22] : memref<10x1xf32, #tpu.memory_space<vmem>>, vector<10x1xf32>
    %24 = vector.broadcast %23 : vector<10x1xf32> to vector<10x256xf32>
    %25 = arith.addf %22, %24 : vector<10x256xf32>
    %cst_23 = arith.constant 5.000000e-01 : f32
    %26 = vector.broadcast %cst_23 : f32 to vector<10x256xf32>
    %27 = arith.mulf %26, %25 : vector<10x256xf32>
    %28 = math.tanh %27 : vector<10x256xf32>
    %cst_24 = arith.constant 5.000000e-01 : f32
    %29 = vector.broadcast %cst_24 : f32 to vector<10x256xf32>
    %30 = arith.mulf %29, %28 : vector<10x256xf32>
    %cst_25 = arith.constant 5.000000e-01 : f32
    %31 = vector.broadcast %cst_25 : f32 to vector<10x256xf32>
    %32 = arith.addf %30, %31 : vector<10x256xf32>
    %c0_26 = arith.constant 0 : index
    %c0_27 = arith.constant 0 : index
    %33 = vector.load %arg10[%c0_26, %c0_27] : memref<32x10xf32, #tpu.memory_space<vmem>>, vector<32x10xf32>
    %cst_28 = arith.constant dense<0.000000e+00> : vector<32x256xf32>
    %34 = tpu.matmul %33, %32, %cst_28 {dimension_numbers = #tpu.dot_dimension_numbers<[1], [0], [0], [1], [0, 0, 1, 1], [], []>} : vector<32x10xf32>, vector<10x256xf32>, vector<32x256xf32> -> vector<32x256xf32>
    %c0_29 = arith.constant 0 : index
    %c0_30 = arith.constant 0 : index
    %35 = vector.load %arg11[%c0_29, %c0_30] : memref<32x1xf32, #tpu.memory_space<vmem>>, vector<32x1xf32>
    %36 = vector.broadcast %35 : vector<32x1xf32> to vector<32x256xf32>
    %37 = arith.addf %34, %36 : vector<32x256xf32>
    %cst_31 = arith.constant 5.000000e-01 : f32
    %38 = vector.broadcast %cst_31 : f32 to vector<32x256xf32>
    %39 = arith.mulf %38, %37 : vector<32x256xf32>
    %40 = math.tanh %39 : vector<32x256xf32>
    %cst_32 = arith.constant 5.000000e-01 : f32
    %41 = vector.broadcast %cst_32 : f32 to vector<32x256xf32>
    %42 = arith.mulf %41, %40 : vector<32x256xf32>
    %cst_33 = arith.constant 5.000000e-01 : f32
    %43 = vector.broadcast %cst_33 : f32 to vector<32x256xf32>
    %44 = arith.addf %42, %43 : vector<32x256xf32>
    %45 = vector.extract_strided_slice %44 {offsets = [0, 0], sizes = [3, 256], strides = [1, 1]} : vector<32x256xf32> to vector<3x256xf32>
    %46 = arith.mulf %45, %0 : vector<3x256xf32>
    %cst_34 = arith.constant dense<0.000000e+00> : vector<256xf32>
    %47 = vector.multi_reduction <add>, %46, %cst_34 [0] : vector<3x256xf32> to vector<256xf32>
    %48 = vector.shape_cast %47 : vector<256xf32> to vector<1x256xf32>
    %49 = vector.extract_strided_slice %44 {offsets = [24, 0], sizes = [1, 256], strides = [1, 1]} : vector<32x256xf32> to vector<1x256xf32>
    %50 = arith.addf %48, %49 : vector<1x256xf32>
    %c0_35 = arith.constant 0 : index
    %c0_36 = arith.constant 0 : index
    %51 = vector.load %arg12[%c0_35, %c0_36] : memref<3x256xf32, #tpu.memory_space<vmem>>, vector<1x256xf32>
    tpu.vector_store %arg12[%c0_35, %c0_36], %50 {strides = array<i32>} : memref<3x256xf32, #tpu.memory_space<vmem>>, vector<1x256xf32>,
    %52 = vector.extract_strided_slice %44 {offsets = [8, 0], sizes = [3, 256], strides = [1, 1]} : vector<32x256xf32> to vector<3x256xf32>
    %53 = arith.mulf %52, %0 : vector<3x256xf32>
    %cst_37 = arith.constant dense<0.000000e+00> : vector<256xf32>
    %54 = vector.multi_reduction <add>, %53, %cst_37 [0] : vector<3x256xf32> to vector<256xf32>
    %55 = vector.shape_cast %54 : vector<256xf32> to vector<1x256xf32>
    %56 = vector.extract_strided_slice %44 {offsets = [25, 0], sizes = [1, 256], strides = [1, 1]} : vector<32x256xf32> to vector<1x256xf32>
    %57 = arith.addf %55, %56 : vector<1x256xf32>
    %c1 = arith.constant 1 : index
    %c0_38 = arith.constant 0 : index
    %58 = vector.load %arg12[%c1, %c0_38] : memref<3x256xf32, #tpu.memory_space<vmem>>, vector<1x256xf32>
    tpu.vector_store %arg12[%c1, %c0_38], %57 {strides = array<i32>} : memref<3x256xf32, #tpu.memory_space<vmem>>, vector<1x256xf32>,
    %59 = vector.extract_strided_slice %44 {offsets = [16, 0], sizes = [3, 256], strides = [1, 1]} : vector<32x256xf32> to vector<3x256xf32>
    %60 = arith.mulf %59, %0 : vector<3x256xf32>
    %cst_39 = arith.constant dense<0.000000e+00> : vector<256xf32>
    %61 = vector.multi_reduction <add>, %60, %cst_39 [0] : vector<3x256xf32> to vector<256xf32>
    %62 = vector.shape_cast %61 : vector<256xf32> to vector<1x256xf32>
    %63 = vector.extract_strided_slice %44 {offsets = [26, 0], sizes = [1, 256], strides = [1, 1]} : vector<32x256xf32> to vector<1x256xf32>
    %64 = arith.addf %62, %63 : vector<1x256xf32>
    %c2 = arith.constant 2 : index
    %c0_40 = arith.constant 0 : index
    %65 = vector.load %arg12[%c2, %c0_40] : memref<3x256xf32, #tpu.memory_space<vmem>>, vector<1x256xf32>
    tpu.vector_store %arg12[%c2, %c0_40], %64 {strides = array<i32>} : memref<3x256xf32, #tpu.memory_space<vmem>>, vector<1x256xf32>,
    return
  }
  func.func @transform_0(%arg0: i32) -> (i32, i32) {
    %c0_i32 = arith.constant 0 : i32
    %c0_i32_0 = arith.constant 0 : i32
    return %arg0, %c0_i32 : i32, i32
  }
  func.func @transform_1(%arg0: i32) -> (i32, i32) {
    %c0_i32 = arith.constant 0 : i32
    %c0_i32_0 = arith.constant 0 : i32
    return %arg0, %c0_i32 : i32, i32
  }
  func.func @transform_2(%arg0: i32) -> (i32, i32) {
    %c0_i32 = arith.constant 0 : i32
    %c0_i32_0 = arith.constant 0 : i32
    return %c0_i32, %arg0 : i32, i32
  }
  func.func @transform_3(%arg0: i32) -> (i32, i32) {
    %c0_i32 = arith.constant 0 : i32
    %c0_i32_0 = arith.constant 0 : i32
    %c0_i32_1 = arith.constant 0 : i32
    return %c0_i32, %c0_i32_0 : i32, i32
  }
  func.func @transform_4(%arg0: i32) -> (i32, i32) {
    %c0_i32 = arith.constant 0 : i32
    %c0_i32_0 = arith.constant 0 : i32
    %c0_i32_1 = arith.constant 0 : i32
    return %c0_i32, %c0_i32_0 : i32, i32
  }
  func.func @transform_5(%arg0: i32) -> (i32, i32) {
    %c0_i32 = arith.constant 0 : i32
    %c0_i32_0 = arith.constant 0 : i32
    %c0_i32_1 = arith.constant 0 : i32
    return %c0_i32, %c0_i32_0 : i32, i32
  }
  func.func @transform_6(%arg0: i32) -> (i32, i32) {
    %c0_i32 = arith.constant 0 : i32
    %c0_i32_0 = arith.constant 0 : i32
    %c0_i32_1 = arith.constant 0 : i32
    return %c0_i32, %c0_i32_0 : i32, i32
  }
  func.func @transform_7(%arg0: i32) -> (i32, i32) {
    %c0_i32 = arith.constant 0 : i32
    %c0_i32_0 = arith.constant 0 : i32
    %c0_i32_1 = arith.constant 0 : i32
    return %c0_i32, %c0_i32_0 : i32, i32
  }
  func.func @transform_8(%arg0: i32) -> (i32, i32) {
    %c0_i32 = arith.constant 0 : i32
    %c0_i32_0 = arith.constant 0 : i32
    %c0_i32_1 = arith.constant 0 : i32
    return %c0_i32, %c0_i32_0 : i32, i32
  }
  func.func @transform_9(%arg0: i32) -> (i32, i32) {
    %c0_i32 = arith.constant 0 : i32
    %c0_i32_0 = arith.constant 0 : i32
    %c0_i32_1 = arith.constant 0 : i32
    return %c0_i32, %c0_i32_0 : i32, i32
  }
  func.func @transform_10(%arg0: i32) -> (i32, i32) {
    %c0_i32 = arith.constant 0 : i32
    %c0_i32_0 = arith.constant 0 : i32
    %c0_i32_1 = arith.constant 0 : i32
    return %c0_i32, %c0_i32_0 : i32, i32
  }
  func.func @transform_11(%arg0: i32) -> (i32, i32) {
    %c0_i32 = arith.constant 0 : i32
    %c0_i32_0 = arith.constant 0 : i32
    return %c0_i32, %arg0 : i32, i32
  }
}

</mosaic_0001>

<bundles_post_ra>
// kernel: _lambda_.1
= control target key start
LH: loop header
LB: loop body
LE: loop exit
PB: predicated region body
PF: predicated region fallthrough
CT: control target
= control target key end

     0   :  { %16 = vsyncpa [#allocation3], 0  ;;  %s2527_s0 = inlined_call_operand.vmem [shape: f32[1024,24], index: 0, kind: input, shape index: {}]   ;;  %s2528_s1 = inlined_call_operand.vmem [shape: f32[1024,24], index: 1, kind: input, shape index: {}]   ;;  %s2529_s2 = inlined_call_operand.vmem [shape: f32[3,1024], index: 2, kind: input, shape index: {}]   ;;  %s2530_s3 = inlined_call_operand.vmem [shape: f32[30,24], index: 3, kind: input, shape index: {}]   ;;  %s2531_s4 = inlined_call_operand.vmem [shape: f32[30,24], index: 4, kind: input, shape index: {}]   ;;  %s2532_s5 = inlined_call_operand.vmem [shape: f32[30,3], index: 5, kind: input, shape index: {}]   ;;  %s2533_s6 = inlined_call_operand.vmem [shape: f32[30,1], index: 6, kind: input, shape index: {}]   ;;  %s2534_s7 = inlined_call_operand.vmem [shape: f32[10,30], index: 7, kind: input, shape index: {}]   ;;  %s2535_s8 = inlined_call_operand.vmem [shape: f32[10,1], index: 8, kind: input, shape index: {}]   ;;  %s2536_s9 = inlined_call_operand.vmem [shape: f32[32,10], index: 9, kind: input, shape index: {}]   ;;  %s2537_s10 = inlined_call_operand.vmem [shape: f32[32,1], index: 10, kind: input, shape index: {}]   ;;  %s2538_s11 = inlined_call_operand.hbm [shape: f32[3,1024], index: 11, kind: output, shape index: {}]  }
   0x1   :  { %18 = vsyncpa [#allocation3 + $0x1], 0  ;;  %s2127_s17 = smov 0   ;;  %s2129_s18 = smov 0  }
   0x2   :  { %s2131_s19 = smov 0   ;;  %s2133_s20 = smov 0  }
   0x3 LB: > { %s2148_s21 = sadd.s32 4294967295, %s2060_s20   ;;  %s1593_s22 = sadd.s32 4294967294, %s2060_s20   ;;  %s2060_s20 = sphi %s2133_s20, %s2548_s20   ;;  %s2056_s19 = sphi %s2131_s19, %s2547_s19   ;;  %s2052_s18 = sphi %s2129_s18, %s2546_s18   ;;  %s2048_s17 = sphi %s2127_s17, %s2545_s17  }
   0x4   : > { %s2152_s23 = sadd.s32 1, %s2060_s20   ;;  %s277_s24 = sadd.s32 1, %s2056_s19 }
   0x5   : > { %s274_s25 = ssub.s32 %s2060_s20, %s2152_s23  ;;  %p287_p0 = scmp.ne.s32.totalorder %s2056_s19, %s2052_s18 }
   0x6   : > { %p275_p1 = scmp.eq.s32.totalorder %s274_s25, 0  ;;  %p288_p2 = scmp.eq.s32.totalorder %s2148_s21, 3 }
   0x7   : > { %p293_p3 = scmp.ne.s32.totalorder %s2052_s18, %s2048_s17  ;;  %p294_p4 = scmp.eq.s32.totalorder %s1593_s22, 3 }
   0x8   : > { %s2163_s26 = scalar_select %p275_p1, %s2056_s19, %s277_s24  }
   0x9   : > { %p2165_p5 = por %p288_p2, %p287_p0  ;;  %p2169_p6 = por %p294_p4, %p293_p3 }
   0xa   : > { %p1596_p7 = scmp.ge.s32.totalorder %s2060_s20, 1  ;;  %p363_p8 = scmp.lt.s32.totalorder %s2060_s20, 5 }
   0xc   : > { %p364_p9 = pnand %p1596_p7, %p363_p8 }
   0xd   : > { %s1598_s29 = sshll.u32 (!%p364_p9), %s2148_s21, 5  ;;  %vm505_vm0 = vcmask (!%p364_p9), 195584   ;;  %v2179_v0 = vld [vmem:[%s2530_s3] sm:$0xff] (!%p364_p9)  ;;  %v2062_v2 = vmov (!%p364_p9), 0   ;;  %v1023_v4 = vld [vmem:[%s2533_s6 + $0x10] sm:$0xff] (!%p364_p9)  ;;  %v1022_v6 = vld [vmem:[%s2533_s6 + $0x8] sm:$0xff] (!%p364_p9) }
   0xe   : > { %367 = sbr.rel (%p364_p9) target bundleno = 878 (0x36e), region = 64  ;;  %p414_p10 = scmp.lt.s32.totalorder (!%p364_p9), %s1598_s29, 127  ;;  %1772 = vmatprep.mubr.msk.f32.mxu0 (!%p364_p9), %vm505_vm0, %v2179_v0  ;;  %v2186_v1 = vld [vmem:[%s2531_s4] sm:$0xff] (!%p364_p9)  ;;  %1955 = vset.pattern.permute.xlu0 (!%p364_p9), %v2062_v2  ;;  %vm2203_vm1 = vmpackc.low (!%p364_p9), %vm505_vm0, %vm505_vm0  ;;  %v1024_v7 = vld [vmem:[%s2533_s6 + $0x18] sm:$0x3f] (!%p364_p9)  ;;  %vm919_vm2 = vcmask (!%p364_p9), 1042432  }
   0xf   : > { %1732 = vmatprep.mubr.msk.f32.mxu1 (!%p364_p9), %vm505_vm0, %v2186_v1  ;;  %v1021_v3 = vld [vmem:[%s2533_s6] sm:$0xff] (!%p364_p9)  ;;  %1956 = vset.pattern.permute.xlu1 (!%p364_p9), %v2062_v2  ;;  %v1088_v25 = vld [vmem:[%s2535_s8 + $0x8] sm:$0x3] (!%p364_p9)  ;;  %v1212_v58 = vld [vmem:[%s2537_s10 + $0x10] sm:$0xff] (!%p364_p9)  ;;  %s1602_s16 = sshll.u32 (!%p364_p9), %s2148_s21, 1  ;;  %vm906_vm3 = vcmask (!%p364_p9), 23552  }
  0x10   : > { %1027 = vperm.xlu0 (!%p364_p9), %1955, %v1021_v3   ;;  %1037 = vperm.xlu1 (!%p364_p9), %1956, %v1023_v4   ;;  %v1087_v18 = vld [vmem:[%s2535_s8] sm:$0xff] (!%p364_p9)  ;;  %v1211_v32 = vld [vmem:[%s2537_s10 + $0x8] sm:$0xff] (!%p364_p9)  ;;  %v1213_v62 = vld [vmem:[%s2537_s10 + $0x18] sm:$0xff] (!%p364_p9)  ;;  %p426_p11 = scmp.lt.s32.totalorder (!%p364_p9), %s1602_s16, 7  ;;  %vm1106_vm4 = vcmask (!%p364_p9), 1045504   ;;  %vm2064_vm5 = vmmov (!%p364_p9), 1  }
  0x11   : > { %v1210_v55 = vld [vmem:[%s2537_s10] sm:$0xff] (!%p364_p9)  ;;  %v435_v5 = vld [vmem:[%s2530_s3 + $0x10] sm:$0xff] (!%p364_p9)  ;;  %vm1881_vm6 = vmpackc.low (!%p364_p9), %vm1106_vm4, %vm2064_vm5  ;;  %vm1099_vm7 = vcmask (!%p364_p9), 244736   ;;  %vm1247_vm8 = vcmask (!%p364_p9), 1041408   ;;  %vm1234_vm10 = vcmask (!%p364_p9), 80896   ;;  %s2066_s12 = smov (!%p364_p9), [#allocation2]  }
  0x12   : > { %vm1887_vm9 = vmpackc.low (!%p364_p9), %vm1247_vm8, %vm2064_vm5 }
  0x14   : > { %1032 = vperm.xlu0 (!%p364_p9), %1955, %v1022_v6   ;;  %1042 = vperm.xlu1 (!%p364_p9), %1956, %v1024_v7  }
  0x15   : > { %s2550_s29 = smov (!%p414_p10, %s1598_s29), 127  ;;  %s2552_s16 = smov (!%p426_p11, %s1602_s16), 7 }
  0x16   : > { %s1599_s22 = sshll.u32 %s2550_s29, 3  ;;  %s1603_s24 = sshll.u32 %s2552_s16, 2 }
  0x17   : > { %s2199_s13 = scalar_lea.vmem %s2527_s0, %s1599_s22  ;;  %s2210_s15 = scalar_lea.vmem %s2528_s1, %s1599_s22 }
  0x18   : > { %v453_v8 = vld [vmem:[%s2199_s13 + $0x80] sm:$0xff]  ;;  %v454_v9 = vld [vmem:[%s2199_s13 + $0x88] sm:$0xff]  ;;  %v455_v13 = vld [vmem:[%s2199_s13 + $0x90] sm:$0xff]  ;;  %1091 = vperm.xlu0 %1955, %v1087_v18   ;;  %1096 = vperm.xlu1 %1956, %v1088_v25   ;;  %s429_s22 = scalar_lea.vmem %s2529_s2, %s1603_s24  ;;  %s1699_s16 = sshll.u32 %s2148_s21, 7 }
  0x19   : > { %v437_v10 = vld [vmem:[%s2199_s13] sm:$0xff]  ;;  %v1828_v11 = vpack.c.bf16 %v454_v9, %v453_v8  ;;  %v438_v12 = vld [vmem:[%s2199_s13 + $0x8] sm:$0xff]  ;;  %v456_v14 = vld [vmem:[%s2199_s13 + $0x98] sm:$0xff] }
  0x1a   : > { %v1831_v15 = vpack.c.bf16 %v438_v12, %v437_v10  ;;  %v1834_v16 = vpack.c.bf16 %v456_v14, %v455_v13  ;;  %v489_v17 = vld [vmem:[%s2210_s15 + $0x80] sm:$0xff]  ;;  %v490_v19 = vld [vmem:[%s2210_s15 + $0x88] sm:$0xff]  ;;  %v439_v22 = vld [vmem:[%s2199_s13 + $0x10] sm:$0xff] }
  0x1b   : > { %1830 = vmatprep.subr.msk.bf16.mxu0 %vm2203_vm1, %v1828_v11  ;;  %v473_v20 = vld [vmem:[%s2210_s15] sm:$0xff]  ;;  %v474_v21 = vld [vmem:[%s2210_s15 + $0x8] sm:$0xff]  ;;  %v1780_v23 = vpack.c.bf16 %v490_v19, %v489_v17  ;;  %v440_v26 = vld [vmem:[%s2199_s13 + $0x18] sm:$0xff] }
  0x1c   : > { %1833 = vmatpush3.bf16.xpose.msk.msra.mxu0 %vm2203_vm1, %v1831_v15  ;;  %v1783_v24 = vpack.c.bf16 %v474_v21, %v473_v20  ;;  %v491_v27 = vld [vmem:[%s2210_s15 + $0x90] sm:$0xff]  ;;  %v492_v28 = vld [vmem:[%s2210_s15 + $0x98] sm:$0xff]  ;;  %v457_v29 = vld [vmem:[%s2199_s13 + $0xa0] sm:$0xff]  ;;  %v1837_v33 = vpack.c.bf16 %v440_v26, %v439_v22  ;;  %1221 = vperm.xlu0 %1955, %v1211_v32  }
  0x1d   : > { %1836 = vmatprep.subr.msk.bf16.mxu0 %vm2203_vm1, %v1834_v16  ;;  %1782 = vmatprep.subr.msk.bf16.mxu1 %vm2203_vm1, %v1780_v23  ;;  %v458_v30 = vld [vmem:[%s2199_s13 + $0xa8] sm:$0xff]  ;;  %v1786_v31 = vpack.c.bf16 %v492_v28, %v491_v27  ;;  %v475_v34 = vld [vmem:[%s2210_s15 + $0x10] sm:$0xff]  ;;  %v476_v35 = vld [vmem:[%s2210_s15 + $0x18] sm:$0xff] }
  0x1e   : > { %1785 = vmatpush3.bf16.xpose.msk.msra.mxu1 %vm2203_vm1, %v1783_v24  ;;  %v1840_v36 = vpack.c.bf16 %v458_v30, %v457_v29  ;;  %v493_v37 = vld [vmem:[%s2210_s15 + $0xa0] sm:$0xff]  ;;  %v494_v38 = vld [vmem:[%s2210_s15 + $0xa8] sm:$0xff]  ;;  %v1789_v39 = vpack.c.bf16 %v476_v35, %v475_v34  ;;  %v459_v43 = vld [vmem:[%s2199_s13 + $0xb0] sm:$0xff]  ;;  %1226 = vperm.xlu1 %1956, %v1212_v58  }
  0x1f   : > { %1788 = vmatprep.subr.msk.bf16.mxu1 %vm2203_vm1, %v1786_v31  ;;  %v1792_v40 = vpack.c.bf16 %v494_v38, %v493_v37  ;;  %v441_v41 = vld [vmem:[%s2199_s13 + $0x20] sm:$0xff]  ;;  %v442_v42 = vld [vmem:[%s2199_s13 + $0x28] sm:$0xff]  ;;  %v460_v44 = vld [vmem:[%s2199_s13 + $0xb8] sm:$0xff] }
  0x20   : > { %v1843_v45 = vpack.c.bf16 %v442_v42, %v441_v41  ;;  %v477_v46 = vld [vmem:[%s2210_s15 + $0x20] sm:$0xff]  ;;  %v478_v47 = vld [vmem:[%s2210_s15 + $0x28] sm:$0xff]  ;;  %v1846_v48 = vpack.c.bf16 %v460_v44, %v459_v43  ;;  %v495_v49 = vld [vmem:[%s2210_s15 + $0xb0] sm:$0xff]  ;;  %1216 = vperm.xlu0 %1955, %v1210_v55  }
  0x21   : > { %v496_v50 = vld [vmem:[%s2210_s15 + $0xb8] sm:$0xff]  ;;  %v1795_v51 = vpack.c.bf16 %v478_v47, %v477_v46  ;;  %v443_v53 = vld [vmem:[%s2199_s13 + $0x30] sm:$0xff]  ;;  %v461_v56 = vld [vmem:[%s2199_s13 + $0xc0] sm:$0xff] }
  0x22   : > { %v1798_v52 = vpack.c.bf16 %v496_v50, %v495_v49  ;;  %v444_v54 = vld [vmem:[%s2199_s13 + $0x38] sm:$0xff]  ;;  %v462_v57 = vld [vmem:[%s2199_s13 + $0xc8] sm:$0xff]  ;;  %v479_v60 = vld [vmem:[%s2210_s15 + $0x30] sm:$0xff]  ;;  %1231 = vperm.xlu1 %1956, %v1213_v62  }
  0x23   : > { %v1849_v59 = vpack.c.bf16 %v444_v54, %v443_v53  ;;  %v480_v61 = vld [vmem:[%s2210_s15 + $0x38] sm:$0xff]  ;;  %v1852_v63 = vpack.c.bf16 %v462_v57, %v461_v56  ;;  %v497_v2 = vld [vmem:[%s2210_s15 + $0xc0] sm:$0xff]  ;;  %v498_v3 = vld [vmem:[%s2210_s15 + $0xc8] sm:$0xff]  ;;  %v2063_v54 = vmov 0.0  }
  0x24   : > { %1839 = vmatpush3.bf16.xpose.msk.msra.mxu0 %vm2203_vm1, %v1837_v33  ;;  %v1801_v4 = vpack.c.bf16 %v480_v61, %v479_v60  ;;  %v1804_v6 = vpack.c.bf16 %v498_v3, %v497_v2  ;;  %v445_v7 = vld [vmem:[%s2199_s13 + $0x40] sm:$0xff]  ;;  %v446_v8 = vld [vmem:[%s2199_s13 + $0x48] sm:$0xff]  ;;  %v463_v9 = vld [vmem:[%s2199_s13 + $0xd0] sm:$0xff] }
  0x25   : > { %1842 = vmatprep.subr.msk.bf16.mxu0 %vm2203_vm1, %v1840_v36  ;;  %v464_v10 = vld [vmem:[%s2199_s13 + $0xd8] sm:$0xff]  ;;  %v1855_v11 = vpack.c.bf16 %v446_v8, %v445_v7  ;;  %v481_v12 = vld [vmem:[%s2210_s15 + $0x40] sm:$0xff]  ;;  %v482_v13 = vld [vmem:[%s2210_s15 + $0x48] sm:$0xff] }
  0x26   : > { %1791 = vmatpush3.bf16.xpose.msk.msra.mxu1 %vm2203_vm1, %v1789_v39  ;;  %v1858_v14 = vpack.c.bf16 %v464_v10, %v463_v9  ;;  %v499_v15 = vld [vmem:[%s2210_s15 + $0xd0] sm:$0xff]  ;;  %v500_v16 = vld [vmem:[%s2210_s15 + $0xd8] sm:$0xff]  ;;  %v1807_v17 = vpack.c.bf16 %v482_v13, %v481_v12  ;;  %v465_v21 = vld [vmem:[%s2199_s13 + $0xe0] sm:$0xff] }
  0x27   : > { %1794 = vmatprep.subr.msk.bf16.mxu1 %vm2203_vm1, %v1792_v40  ;;  %v1810_v18 = vpack.c.bf16 %v500_v16, %v499_v15  ;;  %v447_v19 = vld [vmem:[%s2199_s13 + $0x50] sm:$0xff]  ;;  %v448_v20 = vld [vmem:[%s2199_s13 + $0x58] sm:$0xff]  ;;  %v466_v22 = vld [vmem:[%s2199_s13 + $0xe8] sm:$0xff] }
  0x28   : > { %v1861_v23 = vpack.c.bf16 %v448_v20, %v447_v19  ;;  %v483_v24 = vld [vmem:[%s2210_s15 + $0x50] sm:$0xff]  ;;  %v484_v25 = vld [vmem:[%s2210_s15 + $0x58] sm:$0xff]  ;;  %v1864_v26 = vpack.c.bf16 %v466_v22, %v465_v21  ;;  %v501_v27 = vld [vmem:[%s2210_s15 + $0xe0] sm:$0xff] }
  0x29   : > { %v502_v28 = vld [vmem:[%s2210_s15 + $0xe8] sm:$0xff]  ;;  %v1813_v29 = vpack.c.bf16 %v484_v25, %v483_v24  ;;  %v449_v31 = vld [vmem:[%s2199_s13 + $0x60] sm:$0xff]  ;;  %v467_v33 = vld [vmem:[%s2199_s13 + $0xf0] sm:$0xff] }
  0x2a   : > { %v1816_v30 = vpack.c.bf16 %v502_v28, %v501_v27  ;;  %v450_v32 = vld [vmem:[%s2199_s13 + $0x68] sm:$0xff]  ;;  %v468_v34 = vld [vmem:[%s2199_s13 + $0xf8] sm:$0xff]  ;;  %v485_v36 = vld [vmem:[%s2210_s15 + $0x60] sm:$0xff] }
  0x2b   : > { %v1867_v35 = vpack.c.bf16 %v450_v32, %v449_v31  ;;  %v486_v37 = vld [vmem:[%s2210_s15 + $0x68] sm:$0xff]  ;;  %v1870_v38 = vpack.c.bf16 %v468_v34, %v467_v33  ;;  %v503_v39 = vld [vmem:[%s2210_s15 + $0xf0] sm:$0xff]  ;;  %v504_v40 = vld [vmem:[%s2210_s15 + $0xf8] sm:$0xff] }
  0x2c   : > { %1845 = vmatpush3.bf16.xpose.msk.msra.mxu0 %vm2203_vm1, %v1843_v45  ;;  %v1819_v41 = vpack.c.bf16 %v486_v37, %v485_v36  ;;  %v1822_v42 = vpack.c.bf16 %v504_v40, %v503_v39  ;;  %v451_v43 = vld [vmem:[%s2199_s13 + $0x70] sm:$0xff]  ;;  %v452_v44 = vld [vmem:[%s2199_s13 + $0x78] sm:$0xff]  ;;  %v2358_v45 = vld [vmem:[%s429_s22] sm:$0x77]  ;;  %s2481_s22 = scalar_lea.hbm %s2538_s11, %s1699_s16 }
  0x2d   : > { %1848 = vmatprep.subr.msk.bf16.mxu0 %vm2203_vm1, %v1846_v48  ;;  %v1873_v46 = vpack.c.bf16 %v452_v44, %v451_v43  ;;  %v487_v47 = vld [vmem:[%s2210_s15 + $0x70] sm:$0xff]  ;;  %v488_v48 = vld [vmem:[%s2210_s15 + $0x78] sm:$0xff]  ;;  %v2368_v49 = vcombine.high %v2358_v45, %v2358_v45  ;;  %v900_v55 = vld [vmem:[%s2532_s5] sm:$0xff]  ;;  %s410_s15 = sand.u32 1, %s2052_s18  }
  0x2e   : > { %1797 = vmatpush3.bf16.xpose.msk.msra.mxu1 %vm2203_vm1, %v1795_v51  ;;  %v1825_v50 = vpack.c.bf16 %v488_v48, %v487_v47  ;;  %v434_v51 = vld [vmem:[%s2530_s3 + $0x8] sm:$0xff]  ;;  %v436_v53 = vld [vmem:[%s2530_s3 + $0x18] sm:$0x3f]  ;;  %v902_v57 = vld [vmem:[%s2532_s5 + $0x10] sm:$0xff]  ;;  %s1597_s29 = sshll.u32 %s410_s15, 3  ;;  %s1496_s21 = scalar_lea.sflag [#allocation3], %s410_s15 }
  0x2f   : > { %1800 = vmatprep.subr.msk.bf16.mxu1 %vm2203_vm1, %v1798_v52  ;;  %v470_v52 = vld [vmem:[%s2531_s4 + $0x8] sm:$0xff]  ;;  %v903_v58 = vld [vmem:[%s2532_s5 + $0x18] sm:$0x3f]  ;;  %s412_s14 = scalar_lea.vmem [#allocation2], %s1597_s29  ;;  %s2002_s29 = sshll.u32 %s2066_s12, 4  ;;  %s2003_s29 = int_to_ptr.vmem [resolvable:$false] %s2002_s29 }
  0x30   : > { %v901_v56 = vld [vmem:[%s2532_s5 + $0x8] sm:$0xff]  ;;  %s1510_s24 = sshll.u32 %s412_s14, 4  ;;  %s2004_s16 = scalar_lea.vmem %s2003_s29, 256  ;;  %s2483_s24 = int_to_ptr.vmem [resolvable:$true] %s1510_s24 }
  0x31   : > { %s1998_s13 = scalar_lea.vmem %s2483_s24, 128  ;;  %p2005_p1 = scmp.lt.s32.totalorder %s2483_s24, %s2003_s29 }
  0x32   : > { %p1999_p12 = scmp.ne.s32.totalorder %s2483_s24, %s1998_s13  ;;  %p2006_p2 = scmp.lt.s32.totalorder %s2004_s16, %s1998_s13 }
  0x34   : > { %1851 = vmatpush3.bf16.xpose.msk.msra.mxu0 %vm2203_vm1, %v1849_v59  ;;  %p2000_p13 = pnand %p1999_p12, %p2165_p5  ;;  %p2007_p3 = por %p2006_p2, %p2005_p1 }
  0x35   : > { %1854 = vmatprep.subr.msk.bf16.mxu0 %vm2203_vm1, %v1852_v63 }
  0x36   : > { %1803 = vmatpush3.bf16.xpose.msk.msra.mxu1 %vm2203_vm1, %v1801_v4  ;;  %p2001_p0 = pneg %p2000_p13 }
  0x37   : > { %1806 = vmatprep.subr.msk.bf16.mxu1 %vm2203_vm1, %v1804_v6 }
  0x38   : > { %p2008_p4 = pnand %p2007_p3, %p2001_p0 }
  0x3c   : > { %1857 = vmatpush3.bf16.xpose.msk.msra.mxu0 %vm2203_vm1, %v1855_v11 }
  0x3d   : > { %1860 = vmatprep.subr.msk.bf16.mxu0 %vm2203_vm1, %v1858_v14 }
  0x3e   : > { %1809 = vmatpush3.bf16.xpose.msk.msra.mxu1 %vm2203_vm1, %v1807_v17 }
  0x3f   : > { %1812 = vmatprep.subr.msk.bf16.mxu1 %vm2203_vm1, %v1810_v18 }
  0x44   : > { %1863 = vmatpush3.bf16.xpose.msk.msra.mxu0 %vm2203_vm1, %v1861_v23 }
  0x45   : > { %1866 = vmatprep.subr.msk.bf16.mxu0 %vm2203_vm1, %v1864_v26 }
  0x46   : > { %1815 = vmatpush3.bf16.xpose.msk.msra.mxu1 %vm2203_vm1, %v1813_v29 }
  0x47   : > { %1818 = vmatprep.subr.msk.bf16.mxu1 %vm2203_vm1, %v1816_v30 }
  0x4c   : > { %1869 = vmatpush3.bf16.xpose.msk.msra.mxu0 %vm2203_vm1, %v1867_v35 }
  0x4d   : > { %1872 = vmatprep.subr.msk.bf16.mxu0 %vm2203_vm1, %v1870_v38 }
  0x4e   : > { %1821 = vmatpush3.bf16.xpose.msk.msra.mxu1 %vm2203_vm1, %v1819_v41 }
  0x4f   : > { %1824 = vmatprep.subr.msk.bf16.mxu1 %vm2203_vm1, %v1822_v42 }
  0x54   : > { %1875 = vmatpush3.bf16.xpose.msk.msra.mxu0 %vm2203_vm1, %v1873_v46 }
  0x55   : > { %1676 = vmatprep.subr.msk.mxu0 %vm919_vm2, %v2368_v49 }
  0x56   : > { %1827 = vmatpush3.bf16.xpose.msk.msra.mxu1 %vm2203_vm1, %v1825_v50 }
  0x5b   : > { %1773 = vmatmul.mubr.msk.f32.vlgmr.msra.gmra.mrb[0].mxu0 %vm505_vm0, %v2179_v0  ;;  %v471_v0 = vld [vmem:[%s2531_s4 + $0x10] sm:$0xff] }
  0x5c   : > { %1774 = vmatprep.mubr.msk.f32.mxu0 %vm505_vm0, %v434_v51  ;;  %1677 = vmatpush1.msk.msra.mxu0 %vm919_vm2, %v2358_v45 }
  0x5d   : > { %1733 = vmatmul.mubr.msk.f32.vlgmr.msra.gmra.mrb[0].mxu1 %vm505_vm0, %v2186_v1  ;;  %v472_v1 = vld [vmem:[%s2531_s4 + $0x18] sm:$0x3f] }
  0x5e   : > { %1734 = vmatprep.mubr.msk.f32.mxu1 %vm505_vm0, %v470_v52 }
  0x5f   : > { %1775 = vmatmul.mubr.msk.f32.gmra.mrb[2].mxu0 %vm505_vm0, %v434_v51 }
  0x60   : > { %1776 = vmatprep.mubr.msk.f32.mxu0 %vm505_vm0, %v435_v5 }
  0x61   : > { %1735 = vmatmul.mubr.msk.f32.gmra.mrb[2].mxu1 %vm505_vm0, %v470_v52 }
  0x62   : > { %1736 = vmatprep.mubr.msk.f32.mxu1 %vm505_vm0, %v471_v0 }
  0x63   : > { %1777 = vmatmul.mubr.msk.f32.gmra.mrb[4].mxu0 %vm505_vm0, %v435_v5 }
  0x64   : > { %1778 = vmatprep.mubr.msk.f32.mxu0 %vm505_vm0, %v436_v53 }
  0x65   : > { %1737 = vmatmul.mubr.msk.f32.gmra.mrb[4].mxu1 %vm505_vm0, %v471_v0 }
  0x66   : > { %1738 = vmatprep.mubr.msk.f32.mxu1 %vm505_vm0, %v472_v1 }
  0x67   : > { %1779 = vmatmul.mubr.msk.f32.gmra.mrb[6].mxu0 %vm505_vm0, %v436_v53 }
  0x68   : > { %988 = vmatprep.mubr.f32.mxu0 %v2063_v54 }
  0x69   : > { %1739 = vmatmul.mubr.msk.f32.gmra.mrb[6].mxu1 %vm505_vm0, %v472_v1 }
  0x6a   : > { %1183 = vmatprep.mubr.f32.mxu1 %v2063_v54 }
  0x6b   : > { %1678 = vmatmul.mubr.msk.f32.vlgmr.msra.gmra.mrb[0].mxu0 %vm906_vm3, %v900_v55 }
  0x6c   : > { %994 = vmatprep.mubr.f32.mxu0 %v2063_v54 }
  0x6f   : > { %1679 = vmatmul.mubr.msk.f32.gmra.mrb[2].mxu0 %vm906_vm3, %v901_v56 }
  0x70   : > { %1000 = vmatprep.mubr.f32.mxu0 %v2063_v54 }
  0x73   : > { %1680 = vmatmul.mubr.msk.f32.gmra.mrb[4].mxu0 %vm906_vm3, %v902_v57 }
  0x74   : > { %1006 = vmatprep.mubr.f32.mxu0 %v2063_v54 }
  0x77   : > { %1681 = vmatmul.mubr.msk.f32.gmra.mrb[6].mxu0 %vm906_vm3, %v903_v58 }
  0x78   : > { %1177 = vmatprep.mubr.f32.mxu0 %v2063_v54 }
  0x8f   : > { %v1028_v3 = vpop.permute.xlu0 %1027  ;;  %v1038_v21 = vpop.permute.xlu1 %1037 }
  0x93   : > { %v1033_v17 = vpop.permute.xlu0 %1032  ;;  %v1043_v35 = vpop.permute.xlu1 %1042 }
 0x130   : > { %v680_v59 = vpop.f32.mrb[0].mxu1 }
 0x131   : > { %v682_v60 = vpop.f32.mrb[1].mxu1 }
 0x134   : > { %v686_v61 = vpop.f32.mrb[2].mxu1 }
 0x135   : > { %v688_v62 = vpop.f32.mrb[3].mxu1 }
 0x138   : > { %v692_v63 = vpop.f32.mrb[4].mxu1 }
 0x139   : > { %v694_v2 = vpop.f32.mrb[5].mxu1 }
 0x13c   : > { %v698_v4 = vpop.f32.mrb[6].mxu1 }
 0x13d   : > { %v700_v7 = vpop.f32.mrb[7].mxu1 }
 0x13e   : > { %v990_v6 = vpop.f32.mrb[0].mxu0 }
 0x13f   : > { %v1896_v8 = vadd.f32 %v990_v6, %v680_v59  ;;  %v992_v9 = vpop.f32.mrb[1].mxu0 }
 0x140   : > { %v1897_v10 = vadd.f32 %v992_v9, %v682_v60  ;;  %v1085_v9 = vld [vmem:[%s2534_s7] sm:$0xff] }
 0x141   : > { %v1045_v11 = vadd.f32 %v1896_v8, %v1028_v3 }
 0x142   : > { %v1046_v12 = vadd.f32 %v1897_v10, %v1028_v3  ;;  %v996_v13 = vpop.f32.mrb[2].mxu0  ;;  %v1086_v10 = vld [vmem:[%s2534_s7 + $0x8] sm:$0x3] }
 0x143   : > { %v1053_v14 = vmul.f32 0.5, %v1045_v11  ;;  %v1898_v15 = vadd.f32 %v996_v13, %v686_v61  ;;  %v998_v16 = vpop.f32.mrb[3].mxu0  ;;  %v1092_v11 = vpop.permute.xlu0 %1091 }
 0x144   : > { %v1054_v18 = vmul.f32 0.5, %v1046_v12  ;;  %v1899_v19 = vadd.f32 %v998_v16, %v688_v62  ;;  %v1097_v12 = vpop.permute.xlu1 %1096 }
 0x145   : > { %1958 = vtanh.f32 %v1053_v14  ;;  %v1047_v20 = vadd.f32 %v1898_v15, %v1033_v17 }
 0x146   : > { %1960 = vtanh.f32 %v1054_v18  ;;  %v1048_v22 = vadd.f32 %v1899_v19, %v1033_v17  ;;  %v1002_v23 = vpop.f32.mrb[4].mxu0 }
 0x147   : > { %v1055_v24 = vmul.f32 0.5, %v1047_v20  ;;  %v1900_v25 = vadd.f32 %v1002_v23, %v692_v63  ;;  %v1004_v26 = vpop.f32.mrb[5].mxu0 }
 0x148   : > { %v1056_v27 = vmul.f32 0.5, %v1048_v22  ;;  %v1901_v28 = vadd.f32 %v1004_v26, %v694_v2 }
 0x149   : > { %1962 = vtanh.f32 %v1055_v24  ;;  %v1049_v29 = vadd.f32 %v1900_v25, %v1038_v21 }
 0x14a   : > { %1964 = vtanh.f32 %v1056_v27  ;;  %v1050_v30 = vadd.f32 %v1901_v28, %v1038_v21  ;;  %v1008_v31 = vpop.f32.mrb[6].mxu0 }
 0x14b   : > { %v1057_v32 = vmul.f32 0.5, %v1049_v29  ;;  %v1902_v33 = vadd.f32 %v1008_v31, %v698_v4  ;;  %v1010_v34 = vpop.f32.mrb[7].mxu0 }
 0x14c   : > { %v1058_v36 = vmul.f32 0.5, %v1050_v30  ;;  %v1903_v37 = vadd.f32 %v1010_v34, %v700_v7 }
 0x14d   : > { %1966 = vtanh.f32 %v1057_v32  ;;  %v1051_v38 = vadd.f32 %v1902_v33, %v1043_v35 }
 0x14e   : > { %1968 = vtanh.f32 %v1058_v36  ;;  %v1052_v39 = vadd.f32 %v1903_v37, %v1043_v35 }
 0x14f   : > { %v1959_v40 = vpop.eup %1958  ;;  %v1059_v41 = vmul.f32 0.5, %v1051_v38 }
 0x150   : > { %v1961_v42 = vpop.eup %1960  ;;  %v1060_v43 = vmul.f32 0.5, %v1052_v39  ;;  %v1069_v44 = vmul.f32 0.5, %v1959_v40  ;;  %v1206_v39 = vld [vmem:[%s2536_s9] sm:$0xff]  ;;  %v1207_v40 = vld [vmem:[%s2536_s9 + $0x8] sm:$0xff] }
 0x151   : > { %1970 = vtanh.f32 %v1059_v41  ;;  %v1070_v47 = vmul.f32 0.5, %v1961_v42  ;;  %v1208_v41 = vld [vmem:[%s2536_s9 + $0x10] sm:$0xff]  ;;  %v1209_v42 = vld [vmem:[%s2536_s9 + $0x18] sm:$0xff] }
 0x152   : > { %1972 = vtanh.f32 %v1060_v43  ;;  %v1077_v52 = vadd.f32 0.5, %v1069_v44  ;;  %v1222_v43 = vpop.permute.xlu0 %1221 }
 0x153   : > { %v1963_v46 = vpop.eup %1962  ;;  %v1078_v53 = vadd.f32 0.5, %v1070_v47 }
 0x154   : > { %v1965_v48 = vpop.eup %1964  ;;  %v1071_v50 = vmul.f32 0.5, %v1963_v46 }
 0x155   : > { %v1072_v51 = vmul.f32 0.5, %v1965_v48 }
 0x156   : > { %v1079_v5 = vadd.f32 0.5, %v1071_v50  ;;  %v1217_v44 = vpop.permute.xlu0 %1216 }
 0x157   : > { %v1967_v0 = vpop.eup %1966  ;;  %v1080_v1 = vadd.f32 0.5, %v1072_v51 }
 0x158   : > { %v1969_v55 = vpop.eup %1968  ;;  %v1878_v56 = vpack.c.bf16 %v1079_v5, %v1077_v52  ;;  %v1073_v58 = vmul.f32 0.5, %v1967_v0 }
 0x159   : > { %v1876_v57 = vpack.c.bf16 %v1080_v1, %v1078_v53  ;;  %v1074_v60 = vmul.f32 0.5, %v1969_v55  ;;  %v1227_v1 = vpop.permute.xlu1 %1226 }
 0x15a   : > { %v1081_v2 = vadd.f32 0.5, %v1073_v58 }
 0x15b   : > { %v1971_v59 = vpop.eup %1970  ;;  %1877 = vmatprep.subr.bf16.mxu0 %v1876_v57  ;;  %1892 = vmatprep.subr.bf16.mxu1 %v1876_v57  ;;  %v1082_v4 = vadd.f32 0.5, %v1074_v60 }
 0x15c   : > { %v1973_v61 = vpop.eup %1972  ;;  %v1075_v62 = vmul.f32 0.5, %v1971_v59  ;;  %1879 = vmatpush1.bf16.msra.mxu0 %v1878_v56  ;;  %1894 = vmatpush1.bf16.msra.mxu1 %v1878_v56 }
 0x15d   : > { %v1076_v63 = vmul.f32 0.5, %v1973_v61 }
 0x15e   : > { %v1083_v3 = vadd.f32 0.5, %v1075_v62  ;;  %v1232_v62 = vpop.permute.xlu1 %1231 }
 0x15f   : > { %v1084_v6 = vadd.f32 0.5, %v1076_v63 }
 0x160   : > { %v1883_v7 = vpack.c.bf16 %v1083_v3, %v1081_v2 }
 0x161   : > { %v1880_v8 = vpack.c.bf16 %v1084_v6, %v1082_v4 }
 0x163   : > { %1882 = vmatprep.subr.msk.bf16.mxu0 %vm1881_vm6, %v1880_v8  ;;  %1893 = vmatprep.subr.msk.bf16.mxu1 %vm1881_vm6, %v1880_v8 }
 0x164   : > { %1885 = vmatpush1.bf16.msk.msra.mxu0 %vm1881_vm6, %v1883_v7  ;;  %1895 = vmatpush1.bf16.msk.msra.mxu1 %vm1881_vm6, %v1883_v7 }
 0x167   : > { %1684 = vmatmul.mubr.msk.f32.vlgmr.msra.gmra.mrb[8].mxu0 %vm1099_vm7, %v1085_v9  ;;  %1685 = vmatmul.mubr.msk.f32.vlgmr.msra.gmra.mrb[8].mxu1 %vm1099_vm7, %v1086_v10 }
 0x168   : > { %1318 = vmatprep.mubr.f32.mxu1 %v2063_v54 }
 0x23a   : > { %v1179_v13 = vpop.f32.mrb[8].mxu0  ;;  %v1185_v14 = vpop.f32.mrb[8].mxu1 }
 0x23b   : > { %v1180_v15 = vadd.f32 %v1179_v13, %v1092_v11  ;;  %v1186_v16 = vadd.f32 %v1185_v14, %v1097_v12  ;;  %v1181_v17 = vpop.f32.mrb[9].mxu0  ;;  %v1187_v18 = vpop.f32.mrb[9].mxu1 }
 0x23c   : > { %v1182_v19 = vadd.f32 %v1181_v17, %v1092_v11  ;;  %v1188_v20 = vadd.f32 %v1187_v18, %v1097_v12 }
 0x23d   : > { %v1190_v21 = vmul.f32 0.5, %v1180_v15  ;;  %v1192_v22 = vmul.f32 0.5, %v1186_v16 }
 0x23e   : > { %v1191_v23 = vmul.f32 0.5, %v1182_v19  ;;  %v1193_v24 = vmul.f32 0.5, %v1188_v20 }
 0x23f   : > { %1974 = vtanh.f32 %v1190_v21 }
 0x240   : > { %1976 = vtanh.f32 %v1192_v22 }
 0x241   : > { %1978 = vtanh.f32 %v1191_v23 }
 0x242   : > { %1980 = vtanh.f32 %v1193_v24 }
 0x249   : > { %v1975_v25 = vpop.eup %1974 }
 0x24a   : > { %v1977_v26 = vpop.eup %1976  ;;  %v1198_v27 = vmul.f32 0.5, %v1975_v25 }
 0x24b   : > { %v1979_v28 = vpop.eup %1978  ;;  %v1200_v29 = vmul.f32 0.5, %v1977_v26 }
 0x24c   : > { %v1981_v30 = vpop.eup %1980  ;;  %v1202_v31 = vadd.f32 0.5, %v1198_v27  ;;  %v1199_v32 = vmul.f32 0.5, %v1979_v28 }
 0x24d   : > { %v1204_v33 = vadd.f32 0.5, %v1200_v29  ;;  %v1201_v34 = vmul.f32 0.5, %v1981_v30 }
 0x24e   : > { %v1203_v35 = vadd.f32 0.5, %v1199_v32 }
 0x24f   : > { %v1889_v36 = vpack.c.bf16 %v1204_v33, %v1202_v31  ;;  %v1205_v37 = vadd.f32 0.5, %v1201_v34  ;;  %v2065_v31 = vmov 1966171168  }
 0x250   : > { %v1398_v32 = vunpack.c.l.s4 %v2065_v31 }
 0x251   : > { %v1886_v38 = vpack.c.bf16 %v1205_v37, %v1203_v35 }
 0x253   : > { %1888 = vmatprep.subr.msk.bf16.mxu1 %vm1887_vm9, %v1886_v38 }
 0x254   : > { %1891 = vmatpush1.bf16.msk.msra.mxu1 %vm1887_vm9, %v1889_v36 }
 0x257   : > { %1688 = vmatmul.mubr.msk.f32.vlgmr.msra.gmra.mrb[10].mxu1 %vm1234_vm10, %v1206_v39  ;;  %v1400_v39 = vlaneseq }
 0x258   : > { %1324 = vmatprep.mubr.f32.mxu1 %v2063_v54 }
 0x259   : > { %vm2469_vm11 = vcmp.lt.s32.totalorder %v1400_v39, 256 }
 0x25b   : > { %1689 = vmatmul.mubr.msk.f32.gmra.mrb[12].mxu1 %vm1234_vm10, %v1207_v40 }
 0x25c   : > { %1330 = vmatprep.mubr.f32.mxu1 %v2063_v54 }
 0x25f   : > { %1690 = vmatmul.mubr.msk.f32.gmra.mrb[14].mxu1 %vm1234_vm10, %v1208_v41 }
 0x260   : > { %1336 = vmatprep.mubr.f32.mxu1 %v2063_v54 }
 0x263   : > { %1691 = vmatmul.mubr.msk.f32.gmra.mrb[16].mxu1 %vm1234_vm10, %v1209_v42 }
 0x32a   : > { %v1320_v46 = vpop.f32.mrb[10].mxu1 }
 0x32b   : > { %v1321_v47 = vadd.f32 %v1320_v46, %v1217_v44  ;;  %v1322_v48 = vpop.f32.mrb[11].mxu1 }
 0x32c   : > { %v1323_v50 = vadd.f32 %v1322_v48, %v1217_v44 }
 0x32d   : > { %v1343_v51 = vmul.f32 0.5, %v1321_v47 }
 0x32e   : > { %v1344_v52 = vmul.f32 0.5, %v1323_v50  ;;  %v1326_v5 = vpop.f32.mrb[12].mxu1 }
 0x32f   : > { %1982 = vtanh.f32 %v1343_v51  ;;  %v1327_v0 = vadd.f32 %v1326_v5, %v1222_v43  ;;  %v1328_v53 = vpop.f32.mrb[13].mxu1  ;;  %v1399_v51 = vunpack.c.0.s8 %v1398_v32 }
 0x330   : > { %1984 = vtanh.f32 %v1344_v52  ;;  %v1329_v54 = vadd.f32 %v1328_v53, %v1222_v43 }
 0x331   : > { %v1345_v55 = vmul.f32 0.5, %v1327_v0 }
 0x332   : > { %v1346_v56 = vmul.f32 0.5, %v1329_v54  ;;  %v1332_v57 = vpop.f32.mrb[14].mxu1 }
 0x333   : > { %1986 = vtanh.f32 %v1345_v55  ;;  %v1333_v58 = vadd.f32 %v1332_v57, %v1227_v1  ;;  %v1334_v59 = vpop.f32.mrb[15].mxu1 }
 0x334   : > { %1988 = vtanh.f32 %v1346_v56  ;;  %v1335_v60 = vadd.f32 %v1334_v59, %v1227_v1 }
 0x335   : > { %v1347_v61 = vmul.f32 0.5, %v1333_v58 }
 0x336   : > { %v1348_v63 = vmul.f32 0.5, %v1335_v60  ;;  %v1338_v2 = vpop.f32.mrb[16].mxu1 }
 0x337   : > { %1990 = vtanh.f32 %v1347_v61  ;;  %v1339_v3 = vadd.f32 %v1338_v2, %v1232_v62  ;;  %v1340_v4 = vpop.f32.mrb[17].mxu1 }
 0x338   : > { %1992 = vtanh.f32 %v1348_v63  ;;  %v1341_v6 = vadd.f32 %v1340_v4, %v1232_v62  ;;  %v1401_v63 = vshrl.u32 %v1400_v39, 7 }
 0x339   : > { %v1983_v7 = vpop.eup %1982  ;;  %v1349_v8 = vmul.f32 0.5, %v1339_v3 }
 0x33a   : > { %v1985_v9 = vpop.eup %1984  ;;  %v1359_v10 = vmul.f32 0.5, %v1983_v7  ;;  %v1350_v11 = vmul.f32 0.5, %v1341_v6 }
 0x33b   : > { %v1360_v12 = vmul.f32 0.5, %v1985_v9  ;;  %1994 = vtanh.f32 %v1349_v8 }
 0x33c   : > { %v1367_v13 = vadd.f32 0.5, %v1359_v10  ;;  %1996 = vtanh.f32 %v1350_v11 }
 0x33d   : > { %v1987_v14 = vpop.eup %1986  ;;  %v1368_v15 = vadd.f32 0.5, %v1360_v12 }
 0x33e   : > { %v1989_v16 = vpop.eup %1988  ;;  %v1376_v17 = vmul.f32 %v1367_v13, %v2358_v45  ;;  %v1361_v18 = vmul.f32 0.5, %v1987_v14 }
 0x33f   : > { %v1377_v19 = vmul.f32 %v1368_v15, %v2368_v49  ;;  %v1362_v20 = vmul.f32 0.5, %v1989_v16  ;;  %v1402_v16 = vsub.s32 %v1399_v51, %v1401_v63 }
 0x340   : > { %v1378_v21 = vsel %vm919_vm2, %v1376_v17, 0.0  ;;  %v1369_v22 = vadd.f32 0.5, %v1361_v18 }
 0x341   : > { %v1991_v23 = vpop.eup %1990  ;;  %v1379_v24 = vrot.slane %v1378_v21, 4  ;;  %v1385_v25 = vsel %vm919_vm2, %v1377_v19, 0.0  ;;  %v1370_v26 = vadd.f32 0.5, %v1362_v20 }
 0x342   : > { %v1993_v27 = vpop.eup %1992  ;;  %v1386_v28 = vrot.slane %v1385_v25, 4  ;;  %v1417_v29 = vmul.f32 %v1369_v22, %v2358_v45  ;;  %v1363_v30 = vmul.f32 0.5, %v1991_v23 }
 0x343   : > { %v1380_v33 = vadd.f32 %v1379_v24, %v1378_v21  ;;  %v1418_v34 = vmul.f32 %v1370_v26, %v2368_v49  ;;  %v1364_v35 = vmul.f32 0.5, %v1993_v27 }
 0x344   : > { %v1387_v36 = vadd.f32 %v1386_v28, %v1385_v25  ;;  %v1419_v37 = vsel %vm919_vm2, %v1417_v29, 0.0  ;;  %v1371_v38 = vadd.f32 0.5, %v1363_v30 }
 0x345   : > { %v1995_v40 = vpop.eup %1994  ;;  %v1381_v41 = vrot.slane %v1380_v33, 2  ;;  %v1420_v42 = vrot.slane %v1419_v37, 4  ;;  %v1426_v43 = vsel %vm919_vm2, %v1418_v34, 0.0  ;;  %v1372_v44 = vadd.f32 0.5, %v1364_v35 }
 0x346   : > { %v1997_v46 = vpop.eup %1996  ;;  %v1388_v47 = vrot.slane %v1387_v36, 2  ;;  %v1427_v48 = vrot.slane %v1426_v43, 4  ;;  %v1456_v50 = vmul.f32 %v1371_v38, %v2358_v45  ;;  %v1365_v53 = vmul.f32 0.5, %v1995_v40 }
 0x347   : > { %v1382_v52 = vadd.f32 %v1381_v41, %v1380_v33  ;;  %v1421_v5 = vadd.f32 %v1420_v42, %v1419_v37  ;;  %v1457_v0 = vmul.f32 %v1372_v44, %v2368_v49  ;;  %v1366_v56 = vmul.f32 0.5, %v1997_v46 }
 0x348   : > { %v1389_v1 = vadd.f32 %v1388_v47, %v1387_v36  ;;  %v1428_v54 = vadd.f32 %v1427_v48, %v1426_v43  ;;  %v1458_v55 = vsel %vm919_vm2, %v1456_v50, 0.0  ;;  %v1373_v4 = vadd.f32 0.5, %v1365_v53 }
 0x349   : > { %v1422_v57 = vrot.slane %v1421_v5, 2  ;;  %v1459_v58 = vrot.slane %v1458_v55, 4  ;;  %v1465_v59 = vsel %vm919_vm2, %v1457_v0, 0.0  ;;  %v1383_v60 = vrot.slane %v1382_v52, 1 }
 0x34a   : > { %v1429_v61 = vrot.slane %v1428_v54, 2  ;;  %v1466_v62 = vrot.slane %v1465_v59, 4  ;;  %v1390_v45 = vrot.slane %v1389_v1, 1  ;;  %v1374_v8 = vadd.f32 0.5, %v1366_v56 }
 0x34b   : > { %v1423_v2 = vadd.f32 %v1422_v57, %v1421_v5  ;;  %v1460_v3 = vadd.f32 %v1459_v58, %v1458_v55  ;;  %v1384_v49 = vadd.f32 %v1383_v60, %v1382_v52 }
 0x34c   : > { %v1430_v6 = vadd.f32 %v1429_v61, %v1428_v54  ;;  %v1467_v7 = vadd.f32 %v1466_v62, %v1465_v59  ;;  %v1391_v9 = vadd.f32 %v1390_v45, %v1389_v1 }
 0x34d   : > { %v1461_v10 = vrot.slane %v1460_v3, 2  ;;  %v1392_v11 = vadd.f32 %v1384_v49, %v1373_v4  ;;  %v1424_v12 = vrot.slane %v1423_v2, 1 }
 0x34e   : > { %v1468_v13 = vrot.slane %v1467_v7, 2  ;;  %v1393_v14 = vadd.f32 %v1391_v9, %v1374_v8  ;;  %v1431_v15 = vrot.slane %v1430_v6, 1 }
 0x34f   : > { %v1462_v17 = vadd.f32 %v1461_v10, %v1460_v3  ;;  %v1425_v18 = vadd.f32 %v1424_v12, %v1423_v2 }
 0x350   : > { %v1469_v19 = vadd.f32 %v1468_v13, %v1467_v7  ;;  %v1396_v20 = vcombine.low %v1392_v11, %v1393_v14  ;;  %v1432_v21 = vadd.f32 %v1431_v15, %v1430_v6 }
 0x351   : > { %v1433_v22 = vadd.f32 %v1425_v18, %v1373_v4  ;;  %v1463_v23 = vrot.slane %v1462_v17, 1 }
 0x352   : > { %v1434_v24 = vadd.f32 %v1432_v21, %v1374_v8  ;;  %v1470_v25 = vrot.slane %v1469_v19, 1  ;;  %v1403_v26 = vrot.slane %v1396_v20, %v1402_v16 }
 0x353   : > { %v1464_v27 = vadd.f32 %v1463_v23, %v1462_v17 }
 0x354   : > { %v1437_v29 = vcombine.low %v1433_v22, %v1434_v24  ;;  %v1471_v30 = vadd.f32 %v1470_v25, %v1469_v19  ;;  %v1410_v31 = vrot.slane %v1403_v26, %v1402_v16 }
 0x355   : > { %v1472_v32 = vadd.f32 %v1464_v27, %v1373_v4 }
 0x356   : > { %v1473_v33 = vadd.f32 %v1471_v30, %v1374_v8  ;;  %1416 = vst.msk [vmem:[%s412_s14] ss:$4 sm:$0x3] %vm2469_vm11, %v1410_v31  ;;  %v1444_v34 = vrot.slane %v1437_v29, %v1402_v16 }
 0x358   : > { %v1476_v35 = vcombine.low %v1472_v32, %v1473_v33  ;;  %v1445_v36 = vcombine.high %v1444_v34, %v1444_v34 }
 0x35a   : > { %v1452_v37 = vrot.slane %v1445_v36, %v1402_v16  ;;  %v1483_v38 = vrot.slane %v1476_v35, %v1402_v16 }
 0x35c   : > { %1692 = vst.msk [vmem:[%s412_s14 + $0x1] ss:$4 sm:$0x3] %vm2469_vm11, %v1452_v37  ;;  %v1490_v39 = vrot.slane %v1483_v38, %v1402_v16 }
 0x35e   : > { %v1491_v40 = vcombine.high %v1490_v39, %v1490_v39 }
 0x360   : > { %1693 = vst.msk [vmem:[%s412_s14 + $0x2] ss:$4 sm:$0x3] %vm2469_vm11, %v1491_v40 }
 0x361   : > { %2011 = shalt.err (!%p2008_p4)
}
 0x362   : > { %s2012_s15 = scalar_lea.hbm %s2481_s22, 128  ;;  %s2016_s30 = scalar_lea.hbm %s2538_s11, 512 }
 0x363   : > { %p2013_p7 = scmp.ne.s32.totalorder %s2481_s22, %s2012_s15  ;;  %p2017_p10 = scmp.lt.u32.totalorder %s2481_s22, %s2538_s11 }
 0x364   : > { %p2018_p11 = scmp.lt.u32.totalorder %s2016_s30, %s2012_s15  ;;  %p2020_p13 = scmp.lt.u32.totalorder %s2012_s15, %s2481_s22 }
 0x365   : > { %p2014_p8 = pnand %p2013_p7, %p2165_p5 }
 0x366   : > { %p2019_p12 = por %p2018_p11, %p2017_p10 }
 0x367   : > { %p2015_p9 = pneg %p2014_p8 }
 0x368   : > { %p2021_p0 = por %p2020_p13, %p2019_p12 }
 0x36a   : > { %p2022_p1 = pnand %p2021_p0, %p2015_p9 }
 0x36c   : > { %2025 = shalt.err (!%p2022_p1)
}
 0x36d   : > { %1912 = dma.vmem_to_hbm [thread:$0]  (%p2165_p5), %s2483_s24, 128, %s2481_s22, %s1496_s21  }
 0x36e PF: > { %p1918_p2 = scmp.ge.s32.totalorder %s2060_s20, 2  ;;  %s1522_s13 = sand.u32 1, %s2048_s17  }
 0x36f   : > { %s1523_s16 = scalar_lea.sflag [#allocation3], %s1522_s13 }
 0x370   : > { %p1915_p3 = pnand %p1918_p2, %p2169_p6 }
 0x372   : > { %2043 = dma.done.wait (!%p1915_p3), %s1523_s16, 128  }
 0x373   : > { %2045 = vsyncadd (!%p1915_p3), %s1523_s16, 4294967168  ;;  %p21_p4 = scmp.ge.s32.totalorder %s2152_s23, 6   ;;  %s2545_s17 = smov %s2052_s18 }
 0x374   : > { %s2546_s18 = smov %s2056_s19  ;;  %s2547_s19 = smov %s2163_s26 }
 0x375   : > { %s2548_s20 = smov %s2152_s23  ;;  %23 = sbr.rel (!%p21_p4) target bundleno = 3 (0x3), region = 107 }
 0x37c   :  { %1528 = vsyncpa [#allocation3], 1 }
 0x37d   :  { %1530 = vsyncpa [#allocation3 + $0x1], 1 }

</bundles_post_ra>
